<compile_context>
chip_gen: v7x
topology: tpu7x:2x2x1
jax: 0.10.0
libtpu: 0.0.40
codegen_flags: <defaults>
</compile_context>

<pallas_src>
import functools

import jax
import jax.numpy as jnp
from jax import lax
from jax.experimental import pallas as pl
from jax.experimental.pallas import tpu as pltpu


def _cdiv(a, b):
    return -(-a // b)


def _chunk_loss_sum(x, tgt, img0, pix0, *, n_imgs, hw, mask_img, mask_hw):
    """Masked sum of per-pixel cross-entropy over one compute chunk.

    x   : (cb, C, ch) float32 logits
    tgt : (cb, 1, ch) int32 class indices
    img0: global index of the first image in this chunk (for ragged image blocks)
    pix0: global pixel index of the first lane in this chunk (for ragged pixel tiles)
    """
    m = jnp.max(x, axis=1, keepdims=True)                                   # (cb,1,ch)
    lse = jnp.log(jnp.sum(jnp.exp(x - m), axis=1, keepdims=True)) + m       # logsumexp
    cls = lax.broadcasted_iota(jnp.int32, x.shape, 1)
    picked = jnp.sum(jnp.where(cls == tgt, x, 0.0), axis=1, keepdims=True)  # x[target]
    loss = lse - picked                                                     # (cb,1,ch)

    if mask_hw:
        # Ragged last pixel tile: lanes past H*W hold garbage (possibly NaN) -> use a
        # true select (never a multiply) so nothing leaks into valid lanes.
        pix = pix0 + lax.broadcasted_iota(jnp.int32, loss.shape, 2)
        loss = jnp.where(pix < hw, loss, 0.0)
    if mask_img:
        # Ragged last image block: whole leading rows are garbage -> mask the per-image
        # sums with a 2-D (sublane-axis) iota.
        per_img = jnp.sum(loss, axis=2)                                     # (cb, 1)
        img = img0 + lax.broadcasted_iota(jnp.int32, per_img.shape, 0)
        return jnp.sum(jnp.where(img < n_imgs, per_img, 0.0))
    return jnp.sum(loss)


def _ce_kernel(logits_ref, targets_ref, out_ref, *, n_imgs, hw, bn, tile_hw, cb, ch,
               mask_img, mask_hw):
    n = pl.program_id(0)                      # image-block index
    t = pl.program_id(1)                      # pixel-tile index
    nci = bn // cb                            # image chunks per block
    nch = tile_hw // ch                       # pixel chunks per block

    def chunk(ci, cp):
        i0 = ci * cb
        p0 = cp * ch
        if ch % 128 == 0 and not isinstance(p0, int):
            p0 = pl.multiple_of(p0, 128)
        x = logits_ref[pl.ds(i0, cb), :, pl.ds(p0, ch)].astype(jnp.float32)
        tg = targets_ref[pl.ds(i0, cb), :, pl.ds(p0, ch)].astype(jnp.int32)
        return _chunk_loss_sum(
            x, tg, n * bn + ci * cb, t * tile_hw + cp * ch,
            n_imgs=n_imgs, hw=hw, mask_img=mask_img, mask_hw=mask_hw)

    if nci * nch == 1:
        total = chunk(0, 0)
    else:
        def body(idx, acc):
            return acc + chunk(idx // nch, idx % nch)
        total = lax.fori_loop(0, nci * nch, body, jnp.zeros((), jnp.float32))

    out_ref[0] = jnp.full((1, 1), total, jnp.float32)


def cross_entropy_loss_2d(logits, targets, *, block_bytes=16 * 1024 * 1024,
                          chunk_bytes=2 * 1024 * 1024, interpret=False):
    """Equivalent of CrossEntropyLoss2d().forward(logits, targets).

    logits:  (N, C, H, W) float (f32 or bf16)
    targets: (N, H, W) integer class indices in [0, C)
    returns: scalar float32 loss (mean over N*H*W pixels)
    """
    N, C, H, W = logits.shape
    assert targets.shape == (N, H, W), (logits.shape, targets.shape)
    HW = H * W

    # Free, contiguous reshapes - no transpose, no extra HBM traffic.
    logits3 = logits.reshape(N, C, HW)
    # Keep targets in their (possibly narrow) integer dtype; upcast happens in VMEM.
    if (not jnp.issubdtype(targets.dtype, jnp.integer)
            or jnp.dtype(targets.dtype).itemsize > 4):
        targets = targets.astype(jnp.int32)       # e.g. int64 -> int32 (TPU friendly)
    targets3 = targets.reshape(N, 1, HW)

    # ---- tile sizing (VMEM-padding aware) -------------------------------------------
    l_isz = jnp.dtype(logits.dtype).itemsize
    pack = 8 * max(1, 4 // l_isz)                 # sublanes per 32-bit row: f32->8, bf16->16
    c_pad = _cdiv(C, pack) * pack                 # class rows after sublane padding
    # Double-buffered VMEM bytes per pixel column: padded logits block + padded targets
    # block (the single target row always pads to one 32-bit sublane group = 32 B/lane).
    per_lane = 2 * c_pad * l_isz + 2 * 32
    lanes = max(256, block_bytes // per_lane)     # pixel columns per grid step

    # Compute-chunk width: bounds the in-kernel f32 temporaries (~16*c_pad B per lane).
    ch_lanes = max(128, min(4096, (chunk_bytes // (16 * c_pad)) // 128 * 128))
    # Largest whole image we accept as a single compute chunk (mode B).
    whole_img_limit = max(ch_lanes, (2 * chunk_bytes) // (16 * c_pad + 160))

    if HW >= lanes or HW > whole_img_limit:
        # Mode A: one image per step; tile + chunk the pixel axis (128-aligned tiles).
        bn, cb = 1, 1
        ch = min(ch_lanes, max(128, (min(lanes, HW) // 128) * 128))
        tile_max = max(ch, (min(lanes, HW) // ch) * ch)
        num_tiles = _cdiv(HW, tile_max)
        tile_hw = min(tile_max, _cdiv(_cdiv(HW, num_tiles), ch) * ch)  # balanced tiles
        n_blocks = N
        mask_hw = (num_tiles * tile_hw != HW)
        mask_img = False
    else:
        # Mode B: whole (small) images on the lane axis; batch several images per step.
        tile_hw, num_tiles, ch = HW, 1, HW
        n_blocks = _cdiv(N, min(N, max(1, lanes // HW)))
        bn1 = _cdiv(N, n_blocks)                  # balanced images per step
        cb = min(max(1, ch_lanes // HW), bn1)     # images per compute chunk
        bn = max(cb, (bn1 // cb) * cb)            # bn is a multiple of cb
        n_blocks = _cdiv(N, bn)
        mask_img = (n_blocks * bn != N)
        mask_hw = False

    kernel = functools.partial(
        _ce_kernel, n_imgs=N, hw=HW, bn=bn, tile_hw=tile_hw, cb=cb, ch=ch,
        mask_img=mask_img, mask_hw=mask_hw)

    partials = pl.pallas_call(
        kernel,
        out_shape=jax.ShapeDtypeStruct((n_blocks * num_tiles, 1, 1), jnp.float32),
        grid_spec=pltpu.PrefetchScalarGridSpec(
            num_scalar_prefetch=0,
            grid=(n_blocks, num_tiles),
            in_specs=[
                pl.BlockSpec((bn, C, tile_hw), lambda n, t: (n, 0, t)),
                pl.BlockSpec((bn, 1, tile_hw), lambda n, t: (n, 0, t)),
            ],
            out_specs=pl.BlockSpec((1, 1, 1),
                                   lambda n, t: (n * num_tiles + t, 0, 0)),
        ),
        compiler_params=pltpu.CompilerParams(
            dimension_semantics=("parallel", "parallel"),
            vmem_limit_bytes=32 * 1024 * 1024),
        interpret=interpret,
    )(logits3, targets3)

    # size_average=True: mean over all N*H*W pixels.
    return jnp.sum(partials) * (1.0 / float(N * HW))


def _reference_loss(logits_nchw, targets_nhw):
    # Pure-JAX reference (F.log_softmax(dim=1) + NLLLoss2d mean).
    log_sm = jax.nn.log_softmax(logits_nchw.astype(jnp.float32), axis=1)
    picked = jnp.take_along_axis(
        log_sm, targets_nhw[:, None, :, :].astype(jnp.int32), axis=1)
    return -jnp.mean(picked)


if __name__ == "__main__":
    key = jax.random.PRNGKey(0)

    def _check(n, c, h, w, **kw):
        kl, kt = jax.random.split(jax.random.fold_in(key, n * 1000 + h))
        logits = jax.random.normal(kl, (n, c, h, w), dtype=jnp.float32)
        targets = jax.random.randint(kt, (n, h, w), 0, c, dtype=jnp.int32)
        out = jax.block_until_ready(cross_entropy_loss_2d(logits, targets, **kw))
        ref = _reference_loss(logits, targets)
        assert jnp.allclose(out, ref, rtol=1e-5, atol=1e-5), (n, c, h, w, out, ref)

    # Small shape from the module's typical use (mode B: images batched per step).
    _check(2, 4, 16, 16)
    # Mode A path: pixel tiling + in-kernel chunk loop + ragged last-tile mask.
    _check(1, 4, 63, 64, block_bytes=512 * 1024, chunk_bytes=64 * 1024)
    # Mode B path with a ragged last image block (image-validity mask).
    _check(3, 5, 16, 16, block_bytes=64 * 1024)

    print("KERNEL_OK")
</pallas_src>

<mosaic_0001>
module attributes {stable_mosaic.version = 11 : i64} {
  func.func @_ce_kernel(%arg0: i32, %arg1: i32, %arg2: memref<2x4x256xf32, #tpu.memory_space<vmem>>, %arg3: memref<2x1x256xi32, #tpu.memory_space<vmem>>, %arg4: memref<1x1x1xf32, #tpu.memory_space<vmem>>) attributes {dimension_semantics = [#tpu.dimension_semantics<parallel>, #tpu.dimension_semantics<parallel>], iteration_bounds = array<i64: 1, 1>, scalar_prefetch = 0 : i64, scratch_operands = 0 : i64, tpu.core_type = #tpu.core_type<tc>, window_params = [{transform_indices = @transform_0, window_bounds = array<i64: 2, 4, 256>}, {transform_indices = @transform_1, window_bounds = array<i64: 2, 1, 256>}, {transform_indices = @transform_2, window_bounds = array<i64: 1, 1, 1>}]} {
    %c0 = arith.constant 0 : index
    %c0_0 = arith.constant 0 : index
    %c0_1 = arith.constant 0 : index
    %0 = vector.load %arg2[%c0, %c0_0, %c0_1] : memref<2x4x256xf32, #tpu.memory_space<vmem>>, vector<2x4x256xf32>
    %c0_2 = arith.constant 0 : index
    %c0_3 = arith.constant 0 : index
    %c0_4 = arith.constant 0 : index
    %1 = vector.load %arg3[%c0_2, %c0_3, %c0_4] : memref<2x1x256xi32, #tpu.memory_space<vmem>>, vector<2x1x256xi32>
    %cst = arith.constant dense<0xFF800000> : vector<2x256xf32>
    %2 = vector.multi_reduction <maximumf>, %0, %cst [1] : vector<2x4x256xf32> to vector<2x256xf32>
    %3 = vector.shape_cast %2 : vector<2x256xf32> to vector<2x1x256xf32>
    %4 = vector.broadcast %3 : vector<2x1x256xf32> to vector<2x4x256xf32>
    %5 = arith.subf %0, %4 : vector<2x4x256xf32>
    %6 = math.exp %5 : vector<2x4x256xf32>
    %cst_5 = arith.constant dense<0.000000e+00> : vector<2x256xf32>
    %7 = vector.multi_reduction <add>, %6, %cst_5 [1] : vector<2x4x256xf32> to vector<2x256xf32>
    %8 = vector.shape_cast %7 : vector<2x256xf32> to vector<2x1x256xf32>
    %9 = math.log %8 : vector<2x1x256xf32>
    %10 = arith.addf %9, %3 : vector<2x1x256xf32>
    %11 = tpu.iota {dimensions = array<i32: 1>} : vector<2x4x256xi32>
    %12 = vector.broadcast %1 : vector<2x1x256xi32> to vector<2x4x256xi32>
    %13 = arith.cmpi eq, %11, %12 : vector<2x4x256xi32>
    %cst_6 = arith.constant 0.000000e+00 : f32
    %14 = vector.broadcast %cst_6 : f32 to vector<2x4x256xf32>
    %15 = arith.select %13, %0, %14 : vector<2x4x256xi1>, vector<2x4x256xf32>
    %cst_7 = arith.constant dense<0.000000e+00> : vector<2x256xf32>
    %16 = vector.multi_reduction <add>, %15, %cst_7 [1] : vector<2x4x256xf32> to vector<2x256xf32>
    %17 = vector.shape_cast %16 : vector<2x256xf32> to vector<2x1x256xf32>
    %18 = arith.subf %10, %17 : vector<2x1x256xf32>
    %19 = vector.shape_cast %18 : vector<2x1x256xf32> to vector<1x2x1x256xf32>
    %cst_8 = arith.constant dense<0.000000e+00> : vector<1xf32>
    %20 = vector.multi_reduction <add>, %19, %cst_8 [1, 2, 3] : vector<1x2x1x256xf32> to vector<1xf32>
    %21 = vector.shape_cast %20 : vector<1xf32> to vector<1x1x1x1xf32>
    %22 = vector.extract %21[0, 0, 0, 0] : f32 from vector<1x1x1x1xf32>
    %23 = vector.broadcast %22 : f32 to vector<1x1xf32>
    %c0_9 = arith.constant 0 : index
    %c0_10 = arith.constant 0 : index
    %c0_11 = arith.constant 0 : index
    %24 = vector.load %arg4[%c0_9, %c0_10, %c0_11] : memref<1x1x1xf32, #tpu.memory_space<vmem>>, vector<1x1x1xf32>
    %25 = vector.shape_cast %24 : vector<1x1x1xf32> to vector<1x1xf32>
    %26 = vector.shape_cast %23 : vector<1x1xf32> to vector<1x1x1xf32>
    tpu.vector_store %arg4[%c0_9, %c0_10, %c0_11], %26 {strides = array<i32>} : memref<1x1x1xf32, #tpu.memory_space<vmem>>, vector<1x1x1xf32>,
    return
  }
  func.func @transform_0(%arg0: i32, %arg1: i32) -> (i32, i32, i32) {
    %c0_i32 = arith.constant 0 : i32
    %c0_i32_0 = arith.constant 0 : i32
    return %arg0, %c0_i32, %arg1 : i32, i32, i32
  }
  func.func @transform_1(%arg0: i32, %arg1: i32) -> (i32, i32, i32) {
    %c0_i32 = arith.constant 0 : i32
    %c0_i32_0 = arith.constant 0 : i32
    return %arg0, %c0_i32, %arg1 : i32, i32, i32
  }
  func.func @transform_2(%arg0: i32, %arg1: i32) -> (i32, i32, i32) {
    %c1_i32 = arith.constant 1 : i32
    %0 = arith.muli %arg0, %c1_i32 : i32
    %1 = arith.addi %0, %arg1 : i32
    %c0_i32 = arith.constant 0 : i32
    %c0_i32_0 = arith.constant 0 : i32
    %c0_i32_1 = arith.constant 0 : i32
    return %1, %c0_i32, %c0_i32_0 : i32, i32, i32
  }
}

</mosaic_0001>

<bundles_post_ra>
// kernel: tpu_custom_call.1
= control target key start
LH: loop header
LB: loop body
LE: loop exit
PB: predicated region body
PF: predicated region fallthrough
CT: control target
= control target key end

     0   :  { %7 = vsyncpa [#allocation3], 0  ;;  %s418_s0 = inlined_call_operand.hbm [shape: f32[2,4,256], index: 0, kind: input, shape index: {}]   ;;  %s419_s1 = inlined_call_operand.hbm [shape: s32[2,1,256], index: 1, kind: input, shape index: {}]   ;;  %s420_s2 = inlined_call_operand.hbm [shape: f32[1,1,1], index: 2, kind: output, shape index: {}]  }
   0x1   :  { %8 = vsyncpa [#allocation6], 0 }
   0x2   :  { %9 = vsyncpa [#allocation4], 0  ;;  %s332_s9 = smov [#allocation2]   ;;  %s260_s13 = scalar_lea.hbm %s418_s0, 256 }
   0x3   :  { %s15_s10 = sshll.u32 %s332_s9, 4  ;;  %p261_p0 = scmp.ne.s32.totalorder %s418_s0, %s260_s13  ;;  %s16_s10 = int_to_ptr.vmem [resolvable:$true] %s15_s10 }
   0x4   :  { %p264_p1 = scmp.lt.u32.totalorder %s260_s13, %s418_s0 }
   0x6   :  { %p266_p2 = pnand %p264_p1, %p261_p0 }
   0x8   :  { %269 = shalt.err (!%p266_p2)
}
   0x9   :  { %s270_s18 = scalar_lea.vmem %s16_s10, 256  ;;  %p275_p4 = scmp.lt.s32.totalorder %s16_s10, %s16_s10 }
   0xa   :  { %p271_p3 = scmp.ne.s32.totalorder %s16_s10, %s270_s18  ;;  %p276_p5 = scmp.lt.s32.totalorder %s270_s18, %s270_s18 }
   0xc   :  { %p277_p6 = por %p276_p5, %p275_p4 }
   0xe   :  { %p278_p7 = pnand %p277_p6, %p271_p3 }
  0x10   :  { %281 = shalt.err (!%p278_p7)
}
  0x11   :  { %s333_s19 = smov 128   ;;  %s334_s20 = smov 8  }
  0x12   :  { %21 = dma.hbm_to_vmem [thread:$0]  %s418_s0, 256, %s16_s10, [#allocation3], %s333_s19, %s333_s19, %s334_s20  }
  0x13   :  { %s335_s23 = smov [#allocation5]   ;;  %s282_s27 = scalar_lea.hbm %s419_s1, 64 }
  0x14   :  { %s27_s24 = sshll.u32 %s335_s23, 4  ;;  %p283_p8 = scmp.ne.s32.totalorder %s419_s1, %s282_s27  ;;  %s28_s24 = int_to_ptr.vmem [resolvable:$true] %s27_s24 }
  0x15   :  { %p286_p9 = scmp.lt.u32.totalorder %s282_s27, %s419_s1 }
  0x17   :  { %p288_p10 = pnand %p286_p9, %p283_p8 }
  0x19   :  { %291 = shalt.err (!%p288_p10)
}
  0x1a   :  { %s292_s4 = scalar_lea.vmem %s28_s24, 64  ;;  %p297_p12 = scmp.lt.s32.totalorder %s28_s24, %s28_s24 }
  0x1b   :  { %p293_p11 = scmp.ne.s32.totalorder %s28_s24, %s292_s4  ;;  %p298_p13 = scmp.lt.s32.totalorder %s292_s4, %s292_s4 }
  0x1d   :  { %p299_p0 = por %p298_p13, %p297_p12 }
  0x1f   :  { %p300_p1 = pnand %p299_p0, %p293_p11 }
  0x21   :  { %303 = shalt.err (!%p300_p1)
}
  0x22   :  { %s336_s0 = smov 32   ;;  %s337_s5 = smov 2  }
  0x23   :  { %33 = dma.hbm_to_vmem [thread:$0]  %s419_s1, 64, %s28_s24, [#allocation6], %s336_s0, %s336_s0, %s337_s5  }
  0x24   :  { %326 = dma.done.wait [#allocation3], 256  }
  0x25   :  { %327 = vsyncadd [#allocation3], 4294967040 }
  0x26   :  { %328 = dma.done.wait [#allocation6], 64  }
  0x27   :  { %329 = vsyncadd [#allocation6], 4294967232  ;;  %vm51_vm0 = vcmask 1043456   ;;  %v41_v0 = vld [vmem:[#allocation2] sm:$0xff]  ;;  %v42_v1 = vld [vmem:[#allocation2 + $0x8] sm:$0xff]  ;;  %v140_v26 = vlaneseq  ;;  %vm198_vm5 = vcmask 1040384  }
  0x28   :  { %v47_v2 = vcombine.high %v41_v0, %v41_v0  ;;  %v48_v3 = vcombine.high %v42_v1, %v42_v1  ;;  %v52_v4 = vsel %vm51_vm0, %v41_v0, -inf  ;;  %v66_v5 = vsel %vm51_vm0, %v42_v1, -inf  ;;  %v43_v41 = vld [vmem:[#allocation5] sm:$0x3]  ;;  %v44_v42 = vld [vmem:[#allocation5 + $0x2] sm:$0x3] }
  0x29   :  { %v53_v6 = vrot.slane %v52_v4, 4  ;;  %v67_v7 = vrot.slane %v66_v5, 4  ;;  %v141_v35 = vshrl.u32 %v140_v26, 7  ;;  %s338_s1 = smov [#allocation7]   ;;  %vm216_vm6 = vcmask 0  }
  0x2a   :  { %v59_v8 = vsel %vm51_vm0, %v47_v2, -inf  ;;  %v73_v9 = vsel %vm51_vm0, %v48_v3, -inf  ;;  %s227_s8 = sshll.u32 %s338_s1, 4  ;;  %s228_s8 = int_to_ptr.vmem [resolvable:$true] %s227_s8 }
  0x2b   :  { %v54_v10 = vmax.f32 %v52_v4, %v53_v6  ;;  %v60_v11 = vrot.slane %v59_v8, 4  ;;  %v68_v12 = vmax.f32 %v66_v5, %v67_v7  ;;  %v74_v13 = vrot.slane %v73_v9, 4  ;;  %s304_s10 = scalar_lea.vmem %s228_s8, 16  ;;  %s308_s11 = scalar_lea.vmem %s228_s8, 32 }
  0x2c   :  { %v144_v40 = vsub.s32 0, %v141_v35  ;;  %v148_v43 = vsub.s32 1, %v141_v35  ;;  %p305_p2 = scmp.ne.s32.totalorder %s228_s8, %s304_s10  ;;  %p309_p3 = scmp.lt.s32.totalorder %s228_s8, %s228_s8 }
  0x2d   :  { %v55_v14 = vrot.slane %v54_v10, 2  ;;  %v61_v15 = vmax.f32 %v59_v8, %v60_v11  ;;  %v69_v16 = vrot.slane %v68_v12, 2  ;;  %v75_v17 = vmax.f32 %v73_v9, %v74_v13  ;;  %p310_p4 = scmp.lt.s32.totalorder %s308_s11, %s304_s10 }
  0x2e   :  { %v145_v44 = vrot.slane %v43_v41, %v144_v40  ;;  %v153_v45 = vrot.slane %v44_v42, %v144_v40  ;;  %v149_v46 = vrot.slane %v43_v41, %v148_v43  ;;  %v157_v47 = vrot.slane %v44_v42, %v148_v43 }
  0x2f   :  { %v56_v18 = vmax.f32 %v54_v10, %v55_v14  ;;  %v62_v19 = vrot.slane %v61_v15, 2  ;;  %v70_v20 = vmax.f32 %v68_v12, %v69_v16  ;;  %v76_v21 = vrot.slane %v75_v17, 2  ;;  %p311_p5 = por %p310_p4, %p309_p3 }
  0x30   :  { %vm158_vm1 = vcmp.eq.s32.totalorder %v141_v35, %v145_v44  ;;  %vm160_vm2 = vcmp.eq.s32.totalorder %v141_v35, %v153_v45  ;;  %vm159_vm3 = vcmp.eq.s32.totalorder %v141_v35, %v149_v46  ;;  %vm161_vm4 = vcmp.eq.s32.totalorder %v141_v35, %v157_v47 }
  0x31   :  { %v57_v22 = vrot.slane %v56_v18, 1  ;;  %v63_v23 = vmax.f32 %v61_v15, %v62_v19  ;;  %v71_v24 = vrot.slane %v70_v20, 1  ;;  %v77_v25 = vmax.f32 %v75_v17, %v76_v21  ;;  %p312_p6 = pnand %p311_p5, %p305_p2 }
  0x32   :  { %v162_v48 = vsel %vm158_vm1, %v41_v0, 0.0  ;;  %v164_v50 = vsel %vm160_vm2, %v42_v1, 0.0  ;;  %v163_v54 = vsel %vm159_vm3, %v47_v2, 0.0  ;;  %v165_v55 = vsel %vm161_vm4, %v48_v3, 0.0 }
  0x33   :  { %v382_v27 = vmax.f32 %v56_v18, %v57_v22  ;;  %v64_v28 = vrot.slane %v63_v23, 1  ;;  %v384_v29 = vmax.f32 %v70_v20, %v71_v24  ;;  %v78_v30 = vrot.slane %v77_v25, 1 }
  0x34   :  { %v166_v59 = vsel %vm51_vm0, %v162_v48, 0.0  ;;  %v180_v62 = vsel %vm51_vm0, %v164_v50, 0.0  ;;  %v173_v4 = vsel %vm51_vm0, %v163_v54, 0.0  ;;  %v187_v6 = vsel %vm51_vm0, %v165_v55, 0.0 }
  0x35   :  { %v386_v31 = vmax.f32 %v63_v23, %v64_v28  ;;  %v388_v32 = vmax.f32 %v77_v25, %v78_v30  ;;  %v167_v3 = vrot.slane %v166_v59, 4  ;;  %v181_v9 = vrot.slane %v180_v62, 4 }
  0x36   :  { %v174_v12 = vrot.slane %v173_v4, 4  ;;  %v188_v15 = vrot.slane %v187_v6, 4 }
  0x37   :  { %v84_v33 = vcombine.low %v382_v27, %v386_v31  ;;  %v85_v34 = vcombine.low %v384_v29, %v388_v32  ;;  %v168_v18 = vadd.f32 %v167_v3, %v166_v59  ;;  %v182_v21 = vadd.f32 %v181_v9, %v180_v62 }
  0x38   :  { %v175_v24 = vadd.f32 %v174_v12, %v173_v4  ;;  %v189_v28 = vadd.f32 %v188_v15, %v187_v6 }
  0x39   :  { %v88_v36 = vsub.f32 %v41_v0, %v84_v33  ;;  %v89_v37 = vsub.f32 %v42_v1, %v85_v34  ;;  %v169_v34 = vrot.slane %v168_v18, 2 }
  0x3b   :  { %v90_v38 = vmul.f32 1.442695, %v88_v36  ;;  %v92_v39 = vmul.f32 1.442695, %v89_v37  ;;  %v183_v36 = vrot.slane %v182_v21, 2  ;;  %v170_v40 = vadd.f32 %v169_v34, %v168_v18 }
  0x3d   :  { %248 = vpow2.f32 %v90_v38  ;;  %v176_v38 = vrot.slane %v175_v24, 2  ;;  %v184_v41 = vadd.f32 %v183_v36, %v182_v21  ;;  %v171_v44 = vrot.slane %v170_v40, 1 }
  0x3e   :  { %250 = vpow2.f32 %v92_v39  ;;  %v190_v39 = vrot.slane %v189_v28, 2 }
  0x3f   :  { %v177_v42 = vadd.f32 %v176_v38, %v175_v24  ;;  %v185_v45 = vrot.slane %v184_v41, 1 }
  0x40   :  { %v191_v43 = vadd.f32 %v190_v39, %v189_v28 }
  0x41   :  { %v178_v46 = vrot.slane %v177_v42, 1  ;;  %v186_v54 = vadd.f32 %v185_v45, %v184_v41 }
  0x42   :  { %v192_v48 = vrot.slane %v191_v43, 1 }
  0x47   :  { %v249_v49 = vpop.eup %248 }
  0x48   :  { %v251_v51 = vpop.eup %250  ;;  %v96_v52 = vcombine.high %v249_v49, %v249_v49  ;;  %v100_v53 = vsel %vm51_vm0, %v249_v49, 0.0 }
  0x49   :  { %v97_v56 = vcombine.high %v251_v51, %v251_v51  ;;  %v101_v57 = vrot.slane %v100_v53, 4  ;;  %v114_v58 = vsel %vm51_vm0, %v251_v51, 0.0  ;;  %v172_v51 = vadd.f32 %v171_v44, %v170_v40 }
  0x4a   :  { %v107_v60 = vsel %vm51_vm0, %v96_v52, 0.0  ;;  %v115_v61 = vrot.slane %v114_v58, 4 }
  0x4b   :  { %v102_v63 = vadd.f32 %v101_v57, %v100_v53  ;;  %v108_v0 = vrot.slane %v107_v60, 4  ;;  %v121_v1 = vsel %vm51_vm0, %v97_v56, 0.0 }
  0x4c   :  { %v116_v5 = vadd.f32 %v115_v61, %v114_v58  ;;  %v122_v2 = vrot.slane %v121_v1, 4  ;;  %v179_v58 = vadd.f32 %v178_v46, %v177_v42  ;;  %v193_v61 = vadd.f32 %v192_v48, %v191_v43 }
  0x4d   :  { %v103_v7 = vrot.slane %v102_v63, 2  ;;  %v109_v8 = vadd.f32 %v108_v0, %v107_v60 }
  0x4e   :  { %v117_v10 = vrot.slane %v116_v5, 2  ;;  %v123_v11 = vadd.f32 %v122_v2, %v121_v1 }
  0x4f   :  { %v104_v13 = vadd.f32 %v103_v7, %v102_v63  ;;  %v110_v14 = vrot.slane %v109_v8, 2 }
  0x50   :  { %v118_v16 = vadd.f32 %v117_v10, %v116_v5  ;;  %v124_v17 = vrot.slane %v123_v11, 2 }
  0x51   :  { %v105_v19 = vrot.slane %v104_v13, 1  ;;  %v111_v20 = vadd.f32 %v110_v14, %v109_v8 }
  0x52   :  { %v119_v22 = vrot.slane %v118_v16, 1  ;;  %v125_v23 = vadd.f32 %v124_v17, %v123_v11 }
  0x53   :  { %v106_v25 = vadd.f32 %v105_v19, %v104_v13  ;;  %v112_v26 = vrot.slane %v111_v20, 1 }
  0x54   :  { %v120_v30 = vadd.f32 %v119_v22, %v118_v16  ;;  %v126_v33 = vrot.slane %v125_v23, 1 }
  0x55   :  { %v113_v35 = vadd.f32 %v112_v26, %v111_v20  ;;  %252 = vlog2.f32 %v106_v25 }
  0x56   :  { %v127_v37 = vadd.f32 %v126_v33, %v125_v23  ;;  %254 = vlog2.f32 %v120_v30 }
  0x57   :  { %256 = vlog2.f32 %v113_v35 }
  0x58   :  { %258 = vlog2.f32 %v127_v37 }
  0x5f   :  { %v253_v47 = vpop.eup %252 }
  0x60   :  { %v255_v49 = vpop.eup %254  ;;  %v129_v50 = vmul.f32 0.6931472, %v253_v47 }
  0x61   :  { %v257_v52 = vpop.eup %256  ;;  %v133_v53 = vmul.f32 0.6931472, %v255_v49 }
  0x62   :  { %v259_v55 = vpop.eup %258  ;;  %v131_v56 = vmul.f32 0.6931472, %v257_v52  ;;  %v136_v57 = vadd.f32 %v129_v50, %v382_v27 }
  0x63   :  { %v135_v59 = vmul.f32 0.6931472, %v259_v55  ;;  %v138_v60 = vadd.f32 %v133_v53, %v384_v29 }
  0x64   :  { %v137_v62 = vadd.f32 %v131_v56, %v386_v31  ;;  %v194_v63 = vsub.f32 %v136_v57, %v172_v51 }
  0x65   :  { %v139_v0 = vadd.f32 %v135_v59, %v388_v32  ;;  %v196_v1 = vsub.f32 %v138_v60, %v186_v54 }
  0x66   :  { %v195_v4 = vsub.f32 %v137_v62, %v179_v58  ;;  %v199_v5 = vsel %vm198_vm5, %v194_v63, 0.0 }
  0x67   :  { %v197_v2 = vsub.f32 %v139_v0, %v193_v61  ;;  %v202_v6 = vsel %vm198_vm5, %v196_v1, 0.0 }
  0x68   :  { %v200_v3 = vsel %vm198_vm5, %v195_v4, 0.0 }
  0x69   :  { %v201_v7 = vadd.f32 %v200_v3, %v199_v5  ;;  %v204_v8 = vsel %vm198_vm5, %v197_v2, 0.0 }
  0x6b   :  { %v203_v27 = vadd.f32 %v202_v6, %v201_v7 }
  0x6d   :  { %v205_v9 = vadd.f32 %v204_v8, %v203_v27 }
  0x6f   :  { %206 = vadd.xlane.f32.xlu0 %v205_v9 }
  0xfc   :  { %v207_v10 = vpop.xlane.xlu0 %206 }
  0xfd   :  { %v208_v29 = vrot.slane %v207_v10, 4 }
  0xff   :  { %v209_v11 = vadd.f32 %v208_v29, %v207_v10 }
 0x101   :  { %v210_v12 = vrot.slane %v209_v11, 2 }
 0x103   :  { %v211_v13 = vadd.f32 %v210_v12, %v209_v11 }
 0x105   :  { %v212_v31 = vrot.slane %v211_v13, 1 }
 0x107   :  { %v213_v14 = vadd.f32 %v212_v31, %v211_v13 }
 0x109   :  { %237 = vpush %v213_v14 }
 0x13a   :  { %s238_s9 = spop %237 }
 0x13b   :  { %v215_v32 = vstv %s238_s9 }
 0x13c   :  { %217 = vst.msk [vmem:[#allocation7] sm:$0x1] %vm216_vm6, %v215_v32 }
 0x13d   :  { %315 = shalt.err (!%p312_p6)
}
 0x13e   :  { %s316_s14 = scalar_lea.hbm %s420_s2, 16 }
 0x13f   :  { %p317_p7 = scmp.ne.s32.totalorder %s420_s2, %s316_s14  ;;  %p320_p8 = scmp.lt.u32.totalorder %s316_s14, %s420_s2 }
 0x141   :  { %p322_p9 = pnand %p320_p8, %p317_p7 }
 0x143   :  { %325 = shalt.err (!%p322_p9)
}
 0x144   :  { %230 = dma.vmem_to_hbm [thread:$0]  %s228_s8, 16, %s420_s2, [#allocation4]  }
 0x145   :  { %330 = dma.done.wait [#allocation4], 16  }
 0x146   :  { %331 = vsyncadd [#allocation4], 4294967280 }
 0x147   :  { %234 = vsyncpa [#allocation3], 1 }
 0x148   :  { %235 = vsyncpa [#allocation6], 1 }
 0x149   :  { %236 = vsyncpa [#allocation4], 1 }

</bundles_post_ra>
